<compile_context>
chip_gen: v5e
topology: v5e:2x2
jax: 0.10.0
libtpu: 0.0.40
codegen_flags: <defaults>
</compile_context>

<pallas_src>
import functools

import jax
import jax.numpy as jnp
from jax.experimental import pallas as pl
from jax.experimental.pallas import tpu as pltpu

STATE_DIM = 12
CONTEXT_DIM = 20
ACTION_DIM = 4
HIDDEN = 256
MAX_ACTION = 1.0

MAX_BATCH_TILE = 512      # sweep 256-1024; VMEM nowhere near the limit here
MIN_ROWS_PER_CORE = 128   # don't split across TensorCores below this per core


def _actor_kernel(s_ref, c_ref, w1s_ref, w1c_ref, b1_ref, w2_ref, b2_ref,
                  w3_ref, b3_ref, o_ref, *, max_action):
    # Layer 1: concat fused into a split matmul (state part + context part).
    s = s_ref[...]
    c = c_ref[...]
    h = (jnp.dot(s.astype(w1s_ref.dtype), w1s_ref[...],
                 preferred_element_type=jnp.float32)
         + jnp.dot(c.astype(w1c_ref.dtype), w1c_ref[...],
                   preferred_element_type=jnp.float32)
         + b1_ref[...].astype(jnp.float32))
    h = jnp.maximum(h, 0.0)

    # Layer 2 (256 x 256, MXU, f32 accumulate).
    h = jnp.dot(h.astype(w2_ref.dtype), w2_ref[...],
                preferred_element_type=jnp.float32) + b2_ref[...].astype(jnp.float32)
    h = jnp.maximum(h, 0.0)

    # Layer 3 + tanh (tanh goes to the EUP slot -> effectively free).
    h = jnp.dot(h.astype(w3_ref.dtype), w3_ref[...],
                preferred_element_type=jnp.float32) + b3_ref[...].astype(jnp.float32)
    h = jnp.tanh(h)
    if max_action != 1.0:  # trace-time constant -> skip identity multiply
        h = max_action * h
    o_ref[...] = h.astype(o_ref.dtype)


def _num_tensorcores():
    """Best-effort TensorCores-per-chip (2 on v7x, 1 on v5e/v6e)."""
    try:
        info = pltpu.get_tpu_info()
        for attr in ("num_cores", "tensorcore_count", "num_tensorcores",
                     "core_count", "cores_per_chip"):
            n = getattr(info, attr, None)
            if isinstance(n, int) and n > 0:
                return n
    except Exception:
        pass
    try:
        kind = jax.devices()[0].device_kind.lower()
        if "v7" in kind:
            return 2
    except Exception:
        pass
    return 1


def _default_weight_dtype():
    """bf16 weights on v6e/v7x (half the HBM/VMEM, full-rate MXU); f32 on v5e
    (no bf16 VPU path there, and the one-time 300 KB weight fetch is hidden)."""
    try:
        kind = jax.devices()[0].device_kind.lower()
        if ("v6" in kind) or ("v7" in kind):
            return jnp.bfloat16
    except Exception:
        pass
    return jnp.float32


def _batch_tiling(batch, num_cores):
    """Return (batch_tile, num_grid_steps), sublane (8) aligned.

    * 1-TC chips (v5e/v6e): the grid is a strictly serial loop, so use a
      single step up to MAX_BATCH_TILE; only split when the batch exceeds it.
    * 2-TC chips (v7x): split only when each core gets >= MIN_ROWS_PER_CORE
      rows, and keep the step count even so both cores do equal work.
    """
    b8 = pl.cdiv(batch, 8) * 8
    if num_cores >= 2 and b8 >= 2 * MIN_ROWS_PER_CORE:
        steps = 2 * pl.cdiv(pl.cdiv(b8, 2), MAX_BATCH_TILE)
    else:
        steps = pl.cdiv(b8, MAX_BATCH_TILE)
    steps = max(1, steps)
    tile = max(8, pl.cdiv(pl.cdiv(b8, steps), 8) * 8)
    return tile, steps


def actor_forward(state, context, params, max_action=MAX_ACTION,
                  num_cores=None):
    """Pallas Actor forward.  state: [B, state_dim], context: [B, context_dim].

    `max_action` must be a static Python scalar (not a traced JAX value).
    """
    w1, b1, w2, b2, w3, b3 = params
    B, state_dim = state.shape
    context_dim = context.shape[1]
    hidden = w1.shape[1]
    action_dim = w3.shape[1]

    # Split the first-layer weight (static slice, a few KB) so the kernel can
    # fuse the concat into the first matmul.
    w1s = w1[:state_dim]
    w1c = w1[state_dim:]

    state = state.astype(jnp.float32)
    context = context.astype(jnp.float32)

    if num_cores is None:
        num_cores = _num_tensorcores()
    tile, steps = _batch_tiling(B, num_cores)
    B_pad = tile * steps
    if B_pad != B:
        state = jnp.pad(state, ((0, B_pad - B), (0, 0)))
        context = jnp.pad(context, ((0, B_pad - B), (0, 0)))

    param_bytes = sum(int(p.size) * p.dtype.itemsize
                      for p in (w1, b1, w2, b2, w3, b3))
    cost = pl.CostEstimate(
        flops=2 * B_pad * ((state_dim + context_dim) * hidden
                           + hidden * hidden + hidden * action_dim),
        transcendentals=B_pad * action_dim,
        bytes_accessed=4 * B_pad * (state_dim + context_dim + action_dim)
                       + param_bytes,
    )

    kernel = functools.partial(_actor_kernel, max_action=float(max_action))

    out = pl.pallas_call(
        kernel,
        out_shape=jax.ShapeDtypeStruct((B_pad, action_dim), jnp.float32),
        grid=(steps,),
        in_specs=[
            # activations: tiled over batch
            pl.BlockSpec((tile, state_dim), lambda i: (i, 0)),
            pl.BlockSpec((tile, context_dim), lambda i: (i, 0)),
            # weights / biases: full blocks, resident across all batch tiles
            pl.BlockSpec(w1s.shape, lambda i: (0, 0)),
            pl.BlockSpec(w1c.shape, lambda i: (0, 0)),
            pl.BlockSpec(b1.shape, lambda i: (0, 0)),
            pl.BlockSpec(w2.shape, lambda i: (0, 0)),
            pl.BlockSpec(b2.shape, lambda i: (0, 0)),
            pl.BlockSpec(w3.shape, lambda i: (0, 0)),
            pl.BlockSpec(b3.shape, lambda i: (0, 0)),
        ],
        out_specs=pl.BlockSpec((tile, action_dim), lambda i: (i, 0)),
        compiler_params=pltpu.CompilerParams(
            dimension_semantics=("parallel",)),
        cost_estimate=cost,
    )(state, context, w1s, w1c, b1, w2, b2, w3, b3)

    return out[:B]


def init_actor_params(key, state_dim, action_dim, context_dim,
                      hidden=HIDDEN, dtype=None):
    """Deterministic PyTorch-Linear-style init (uniform +-1/sqrt(fan_in)).
    Weights stored as [in, out] (transposed vs. nn.Linear).  dtype=None picks
    bf16 on v6e/v7x and f32 on v5e; f32 MXU accumulation is kept in-kernel."""
    if dtype is None:
        dtype = _default_weight_dtype()
    dims = [(state_dim + context_dim, hidden), (hidden, hidden),
            (hidden, action_dim)]
    params = []
    for fan_in, fan_out in dims:
        key, kw, kb = jax.random.split(key, 3)
        bound = 1.0 / float(jnp.sqrt(float(fan_in)))
        w = jax.random.uniform(kw, (fan_in, fan_out), jnp.float32, -bound, bound)
        b = jax.random.uniform(kb, (1, fan_out), jnp.float32, -bound, bound)
        params += [w.astype(dtype), b.astype(dtype)]
    return tuple(params)


def actor_forward_ref(state, context, params, max_action=MAX_ACTION):
    w1, b1, w2, b2, w3, b3 = params
    x = jnp.concatenate([state, context], axis=-1).astype(jnp.float32)
    a = jax.nn.relu(x @ w1.astype(jnp.float32) + b1.astype(jnp.float32))
    a = jax.nn.relu(a @ w2.astype(jnp.float32) + b2.astype(jnp.float32))
    return max_action * jnp.tanh(a @ w3.astype(jnp.float32)
                                 + b3.astype(jnp.float32))


if __name__ == "__main__":
    key = jax.random.PRNGKey(0)
    kp, ks, kc = jax.random.split(key, 3)

    # f32 params for exact-tolerance checks against the f32 reference.
    params_f32 = init_actor_params(kp, STATE_DIM, ACTION_DIM, CONTEXT_DIM,
                                   dtype=jnp.float32)

    # Small batch (single tile, padded from 2 -> 8 rows).
    batch = 2
    state = jax.random.normal(ks, (batch, STATE_DIM), jnp.float32)
    context = jax.random.normal(kc, (batch, CONTEXT_DIM), jnp.float32)

    out = jax.block_until_ready(actor_forward(state, context, params_f32,
                                              MAX_ACTION))
    ref = actor_forward_ref(state, context, params_f32, MAX_ACTION)
    assert out.shape == (batch, ACTION_DIM)
    assert jnp.allclose(out, ref, atol=1e-5, rtol=1e-5), "mismatch (batch=2)"

    # Larger batch: exercises batch padding + generation-aware tiling
    # (single 304-row step on v5e/v6e, two 152-row steps on v7x).
    batch2 = 300
    ks2, kc2 = jax.random.split(jax.random.PRNGKey(1))
    state2 = jax.random.normal(ks2, (batch2, STATE_DIM), jnp.float32)
    context2 = jax.random.normal(kc2, (batch2, CONTEXT_DIM), jnp.float32)

    out2 = jax.block_until_ready(actor_forward(state2, context2, params_f32))
    ref2 = actor_forward_ref(state2, context2, params_f32)
    assert out2.shape == (batch2, ACTION_DIM)
    assert jnp.allclose(out2, ref2, atol=1e-5, rtol=1e-5), "mismatch (batch=300)"

    # bf16-weight path (the v6e/v7x default): looser tolerance because the
    # kernel casts the hidden activation to bf16 before layers 2/3.
    params_bf16 = init_actor_params(kp, STATE_DIM, ACTION_DIM, CONTEXT_DIM,
                                    dtype=jnp.bfloat16)
    out3 = jax.block_until_ready(actor_forward(state2, context2, params_bf16))
    ref3 = actor_forward_ref(state2, context2, params_bf16)
    assert out3.shape == (batch2, ACTION_DIM)
    assert jnp.allclose(out3, ref3, atol=5e-2, rtol=5e-2), "mismatch (bf16)"

    print("KERNEL_OK")
</pallas_src>

<mosaic_0001>
module attributes {stable_mosaic.version = 11 : i64} {
  func.func @_actor_kernel(%arg0: i32, %arg1: memref<8x12xf32, #tpu.memory_space<vmem>>, %arg2: memref<8x20xf32, #tpu.memory_space<vmem>>, %arg3: memref<12x256xf32, #tpu.memory_space<vmem>>, %arg4: memref<20x256xf32, #tpu.memory_space<vmem>>, %arg5: memref<1x256xf32, #tpu.memory_space<vmem>>, %arg6: memref<256x256xf32, #tpu.memory_space<vmem>>, %arg7: memref<1x256xf32, #tpu.memory_space<vmem>>, %arg8: memref<256x4xf32, #tpu.memory_space<vmem>>, %arg9: memref<1x4xf32, #tpu.memory_space<vmem>>, %arg10: memref<8x4xf32, #tpu.memory_space<vmem>>) attributes {dimension_semantics = [#tpu.dimension_semantics<parallel>], iteration_bounds = array<i64: 1>, scalar_prefetch = 0 : i64, scratch_operands = 0 : i64, tpu.core_type = #tpu.core_type<tc>, window_params = [{transform_indices = @transform_0, window_bounds = array<i64: 8, 12>}, {transform_indices = @transform_1, window_bounds = array<i64: 8, 20>}, {pipeline_mode = #tpu.pipeline_mode<synchronous>, transform_indices = @transform_2, window_bounds = array<i64: 12, 256>}, {pipeline_mode = #tpu.pipeline_mode<synchronous>, transform_indices = @transform_3, window_bounds = array<i64: 20, 256>}, {pipeline_mode = #tpu.pipeline_mode<synchronous>, transform_indices = @transform_4, window_bounds = array<i64: 1, 256>}, {pipeline_mode = #tpu.pipeline_mode<synchronous>, transform_indices = @transform_5, window_bounds = array<i64: 256, 256>}, {pipeline_mode = #tpu.pipeline_mode<synchronous>, transform_indices = @transform_6, window_bounds = array<i64: 1, 256>}, {pipeline_mode = #tpu.pipeline_mode<synchronous>, transform_indices = @transform_7, window_bounds = array<i64: 256, 4>}, {pipeline_mode = #tpu.pipeline_mode<synchronous>, transform_indices = @transform_8, window_bounds = array<i64: 1, 4>}, {transform_indices = @transform_9, window_bounds = array<i64: 8, 4>}]} {
    %c0 = arith.constant 0 : index
    %c0_0 = arith.constant 0 : index
    %0 = vector.load %arg1[%c0, %c0_0] : memref<8x12xf32, #tpu.memory_space<vmem>>, vector<8x12xf32>
    %c0_1 = arith.constant 0 : index
    %c0_2 = arith.constant 0 : index
    %1 = vector.load %arg2[%c0_1, %c0_2] : memref<8x20xf32, #tpu.memory_space<vmem>>, vector<8x20xf32>
    %c0_3 = arith.constant 0 : index
    %c0_4 = arith.constant 0 : index
    %2 = vector.load %arg3[%c0_3, %c0_4] : memref<12x256xf32, #tpu.memory_space<vmem>>, vector<12x256xf32>
    %cst = arith.constant dense<0.000000e+00> : vector<8x256xf32>
    %3 = tpu.matmul %0, %2, %cst {dimension_numbers = #tpu.dot_dimension_numbers<[1], [0], [0], [1], [0, 0, 1, 1], [], []>} : vector<8x12xf32>, vector<12x256xf32>, vector<8x256xf32> -> vector<8x256xf32>
    %c0_5 = arith.constant 0 : index
    %c0_6 = arith.constant 0 : index
    %4 = vector.load %arg4[%c0_5, %c0_6] : memref<20x256xf32, #tpu.memory_space<vmem>>, vector<20x256xf32>
    %cst_7 = arith.constant dense<0.000000e+00> : vector<8x256xf32>
    %5 = tpu.matmul %1, %4, %cst_7 {dimension_numbers = #tpu.dot_dimension_numbers<[1], [0], [0], [1], [0, 0, 1, 1], [], []>} : vector<8x20xf32>, vector<20x256xf32>, vector<8x256xf32> -> vector<8x256xf32>
    %6 = arith.addf %3, %5 : vector<8x256xf32>
    %c0_8 = arith.constant 0 : index
    %c0_9 = arith.constant 0 : index
    %7 = vector.load %arg5[%c0_8, %c0_9] : memref<1x256xf32, #tpu.memory_space<vmem>>, vector<1x256xf32>
    %8 = vector.broadcast %7 : vector<1x256xf32> to vector<8x256xf32>
    %9 = arith.addf %6, %8 : vector<8x256xf32>
    %cst_10 = arith.constant 0.000000e+00 : f32
    %10 = vector.broadcast %cst_10 : f32 to vector<8x256xf32>
    %11 = arith.maximumf %9, %10 : vector<8x256xf32>
    %c0_11 = arith.constant 0 : index
    %c0_12 = arith.constant 0 : index
    %12 = vector.load %arg6[%c0_11, %c0_12] : memref<256x256xf32, #tpu.memory_space<vmem>>, vector<256x256xf32>
    %cst_13 = arith.constant dense<0.000000e+00> : vector<8x256xf32>
    %13 = tpu.matmul %11, %12, %cst_13 {dimension_numbers = #tpu.dot_dimension_numbers<[1], [0], [0], [1], [0, 0, 1, 1], [], []>} : vector<8x256xf32>, vector<256x256xf32>, vector<8x256xf32> -> vector<8x256xf32>
    %c0_14 = arith.constant 0 : index
    %c0_15 = arith.constant 0 : index
    %14 = vector.load %arg7[%c0_14, %c0_15] : memref<1x256xf32, #tpu.memory_space<vmem>>, vector<1x256xf32>
    %15 = vector.broadcast %14 : vector<1x256xf32> to vector<8x256xf32>
    %16 = arith.addf %13, %15 : vector<8x256xf32>
    %cst_16 = arith.constant 0.000000e+00 : f32
    %17 = vector.broadcast %cst_16 : f32 to vector<8x256xf32>
    %18 = arith.maximumf %16, %17 : vector<8x256xf32>
    %c0_17 = arith.constant 0 : index
    %c0_18 = arith.constant 0 : index
    %19 = vector.load %arg8[%c0_17, %c0_18] : memref<256x4xf32, #tpu.memory_space<vmem>>, vector<256x4xf32>
    %cst_19 = arith.constant dense<0.000000e+00> : vector<8x4xf32>
    %20 = tpu.matmul %18, %19, %cst_19 {dimension_numbers = #tpu.dot_dimension_numbers<[1], [0], [0], [1], [0, 0, 1, 1], [], []>} : vector<8x256xf32>, vector<256x4xf32>, vector<8x4xf32> -> vector<8x4xf32>
    %c0_20 = arith.constant 0 : index
    %c0_21 = arith.constant 0 : index
    %21 = vector.load %arg9[%c0_20, %c0_21] : memref<1x4xf32, #tpu.memory_space<vmem>>, vector<1x4xf32>
    %22 = vector.broadcast %21 : vector<1x4xf32> to vector<8x4xf32>
    %23 = arith.addf %20, %22 : vector<8x4xf32>
    %24 = math.tanh %23 : vector<8x4xf32>
    %c0_22 = arith.constant 0 : index
    %c0_23 = arith.constant 0 : index
    %25 = vector.load %arg10[%c0_22, %c0_23] : memref<8x4xf32, #tpu.memory_space<vmem>>, vector<8x4xf32>
    tpu.vector_store %arg10[%c0_22, %c0_23], %24 {strides = array<i32>} : memref<8x4xf32, #tpu.memory_space<vmem>>, vector<8x4xf32>,
    return
  }
  func.func @transform_0(%arg0: i32) -> (i32, i32) {
    %c0_i32 = arith.constant 0 : i32
    %c0_i32_0 = arith.constant 0 : i32
    return %arg0, %c0_i32 : i32, i32
  }
  func.func @transform_1(%arg0: i32) -> (i32, i32) {
    %c0_i32 = arith.constant 0 : i32
    %c0_i32_0 = arith.constant 0 : i32
    return %arg0, %c0_i32 : i32, i32
  }
  func.func @transform_2(%arg0: i32) -> (i32, i32) {
    %c0_i32 = arith.constant 0 : i32
    %c0_i32_0 = arith.constant 0 : i32
    %c0_i32_1 = arith.constant 0 : i32
    return %c0_i32, %c0_i32_0 : i32, i32
  }
  func.func @transform_3(%arg0: i32) -> (i32, i32) {
    %c0_i32 = arith.constant 0 : i32
    %c0_i32_0 = arith.constant 0 : i32
    %c0_i32_1 = arith.constant 0 : i32
    return %c0_i32, %c0_i32_0 : i32, i32
  }
  func.func @transform_4(%arg0: i32) -> (i32, i32) {
    %c0_i32 = arith.constant 0 : i32
    %c0_i32_0 = arith.constant 0 : i32
    %c0_i32_1 = arith.constant 0 : i32
    return %c0_i32, %c0_i32_0 : i32, i32
  }
  func.func @transform_5(%arg0: i32) -> (i32, i32) {
    %c0_i32 = arith.constant 0 : i32
    %c0_i32_0 = arith.constant 0 : i32
    %c0_i32_1 = arith.constant 0 : i32
    return %c0_i32, %c0_i32_0 : i32, i32
  }
  func.func @transform_6(%arg0: i32) -> (i32, i32) {
    %c0_i32 = arith.constant 0 : i32
    %c0_i32_0 = arith.constant 0 : i32
    %c0_i32_1 = arith.constant 0 : i32
    return %c0_i32, %c0_i32_0 : i32, i32
  }
  func.func @transform_7(%arg0: i32) -> (i32, i32) {
    %c0_i32 = arith.constant 0 : i32
    %c0_i32_0 = arith.constant 0 : i32
    %c0_i32_1 = arith.constant 0 : i32
    return %c0_i32, %c0_i32_0 : i32, i32
  }
  func.func @transform_8(%arg0: i32) -> (i32, i32) {
    %c0_i32 = arith.constant 0 : i32
    %c0_i32_0 = arith.constant 0 : i32
    %c0_i32_1 = arith.constant 0 : i32
    return %c0_i32, %c0_i32_0 : i32, i32
  }
  func.func @transform_9(%arg0: i32) -> (i32, i32) {
    %c0_i32 = arith.constant 0 : i32
    %c0_i32_0 = arith.constant 0 : i32
    return %arg0, %c0_i32 : i32, i32
  }
}

</mosaic_0001>

<bundles_post_ra>
// kernel: tpu_custom_call.1
= control target key start
LH: loop header
LB: loop body
LE: loop exit
PB: predicated region body
PF: predicated region fallthrough
CT: control target
= control target key end

     0   :  { %14 = vsyncpa [#allocation3], 0  ;;  %s447_s12 = smov [#allocation2]   ;;  %s448_s14 = smov 256   ;;  %s651_s0 = inlined_call_operand.vmem [shape: f32[8,12], index: 0, kind: input, shape index: {}]   ;;  %s652_s1 = inlined_call_operand.vmem [shape: f32[8,20], index: 1, kind: input, shape index: {}]   ;;  %s653_s2 = inlined_call_operand.vmem [shape: f32[12,256], index: 2, kind: input, shape index: {}]   ;;  %s654_s3 = inlined_call_operand.vmem [shape: f32[20,256], index: 3, kind: input, shape index: {}]   ;;  %s655_s4 = inlined_call_operand.vmem [shape: f32[1,256], index: 4, kind: input, shape index: {}]   ;;  %s656_s5 = inlined_call_operand.hbm [shape: f32[256,256], index: 5, kind: input, shape index: {}]   ;;  %s657_s6 = inlined_call_operand.vmem [shape: f32[1,256], index: 6, kind: input, shape index: {}]   ;;  %s658_s7 = inlined_call_operand.vmem [shape: f32[256,4], index: 7, kind: input, shape index: {}]   ;;  %s659_s8 = inlined_call_operand.vmem [shape: f32[1,4], index: 8, kind: input, shape index: {}]   ;;  %s660_s9 = inlined_call_operand.vmem [shape: f32[8,4], index: 9, kind: output, shape index: {}]  }
   0x1   :  { %s29_s11 = sshll.u32 %s656_s5, 4  ;;  %s31_s13 = sshll.u32 %s447_s12, 4  ;;  %s30_s11 = int_to_ptr.hbm [resolvable:$true] %s29_s11  ;;  %s32_s13 = int_to_ptr.vmem [resolvable:$true] %s31_s13 }
   0x2   :  { %s449_s15 = smov 16  }
   0x3   :  { %37 = dma.hbm_to_vmem [thread:$0]  %s30_s11, 8192, %s32_s13, [#allocation3], %s448_s14, %s448_s14, %s449_s15  }
   0x4   :  { %445 = dma.done.wait [#allocation3], 8192  }
   0x5   :  { %446 = vsyncadd [#allocation3], 4294959104  ;;  %vm64_vm0 = vcmask 1043456   ;;  %v58_v0 = vld [vmem:[%s654_s3 + $0x20] sm:$0xf]  ;;  %v56_v2 = vld [vmem:[%s654_s3 + $0x10] sm:$0xff] }
   0x6   :  { %v59_v1 = vld [vmem:[%s654_s3 + $0x28] sm:$0xf]  ;;  %407 = vmatpush.msk.msra.mxu0 %vm64_vm0, %v58_v0  ;;  %v57_v3 = vld [vmem:[%s654_s3 + $0x18] sm:$0xff]  ;;  %v54_v4 = vld [vmem:[%s654_s3] sm:$0xff]  ;;  %vm60_vm1 = vcmask 162816   ;;  %vm111_vm2 = vcmask 97280  }
   0x7   :  { %409 = vmatpush.msk.msra.mxu1 %vm64_vm0, %v59_v1  ;;  %v55_v5 = vld [vmem:[%s654_s3 + $0x8] sm:$0xff]  ;;  %v49_v6 = vld [vmem:[%s652_s1] sm:$0xff]  ;;  %v52_v7 = vld [vmem:[%s653_s2 + $0x10] sm:$0xf]  ;;  %vm400_vm3 = vcmask 31744  }
   0x8   :  { %85 = vmatpush.msra.mxu0 %v56_v2  ;;  %v53_v8 = vld [vmem:[%s653_s2 + $0x18] sm:$0xf]  ;;  %v201_v9 = vld [vmem:[#allocation2 + $0xf0] sm:$0xff]  ;;  %v50_v11 = vld [vmem:[%s653_s2] sm:$0xff] }
   0x9   :  { %105 = vmatpush.msra.mxu1 %v57_v3  ;;  %v233_v10 = vld [vmem:[#allocation2 + $0x1f0] sm:$0xff]  ;;  %v51_v12 = vld [vmem:[%s653_s2 + $0x8] sm:$0xff]  ;;  %v202_v13 = vld [vmem:[#allocation2 + $0xf8] sm:$0xff]  ;;  %241 = vmatpush.msra.mxu2 %v201_v9 }
   0xa   :  { %86 = vmatpush.msra.mxu0 %v54_v4  ;;  %v234_v14 = vld [vmem:[#allocation2 + $0x1f8] sm:$0xff]  ;;  %261 = vmatpush.msra.mxu3 %v233_v10  ;;  %v199_v15 = vld [vmem:[#allocation2 + $0xe0] sm:$0xff]  ;;  %v200_v17 = vld [vmem:[#allocation2 + $0xe8] sm:$0xff] }
   0xb   :  { %106 = vmatpush.msra.mxu1 %v55_v5  ;;  %408 = vmatmul.msk.f32.vlgmr.msra.gmra.mxu0 %vm60_vm1, %v49_v6  ;;  %v231_v16 = vld [vmem:[#allocation2 + $0x1e0] sm:$0xff]  ;;  %v232_v18 = vld [vmem:[#allocation2 + $0x1e8] sm:$0xff]  ;;  %v197_v19 = vld [vmem:[#allocation2 + $0xd0] sm:$0xff] }
   0xc   :  { %410 = vmatmul.msk.f32.vlgmr.msra.gmra.mxu1 %vm60_vm1, %v49_v6  ;;  %411 = vmatpush.msk.msrb.mxu0 %vm64_vm0, %v52_v7  ;;  %v229_v20 = vld [vmem:[#allocation2 + $0x1d0] sm:$0xff]  ;;  %v48_v21 = vld [vmem:[%s651_s0] sm:$0xff]  ;;  %v198_v22 = vld [vmem:[#allocation2 + $0xd8] sm:$0xff] }
   0xd   :  { %413 = vmatpush.msk.msrb.mxu1 %vm64_vm0, %v53_v8  ;;  %242 = vmatpush.msra.mxu2 %v199_v15  ;;  %v230_v23 = vld [vmem:[#allocation2 + $0x1d8] sm:$0xff]  ;;  %v195_v24 = vld [vmem:[#allocation2 + $0xc0] sm:$0xff]  ;;  %v196_v26 = vld [vmem:[#allocation2 + $0xc8] sm:$0xff] }
   0xe   :  { %136 = vmatpush.msrb.mxu0 %v50_v11  ;;  %262 = vmatpush.msra.mxu3 %v231_v16  ;;  %v227_v25 = vld [vmem:[#allocation2 + $0x1c0] sm:$0xff]  ;;  %v228_v27 = vld [vmem:[#allocation2 + $0x1c8] sm:$0xff]  ;;  %v193_v28 = vld [vmem:[#allocation2 + $0xb0] sm:$0xff] }
   0xf   :  { %156 = vmatpush.msrb.mxu1 %v51_v12  ;;  %243 = vmatpush.msra.mxu2 %v197_v19  ;;  %v225_v29 = vld [vmem:[#allocation2 + $0x1b0] sm:$0xff]  ;;  %v194_v30 = vld [vmem:[#allocation2 + $0xb8] sm:$0xff]  ;;  %v191_v32 = vld [vmem:[#allocation2 + $0xa0] sm:$0xff] }
  0x10   :  { %281 = vmatpush.msra.mxu0 %v202_v13  ;;  %263 = vmatpush.msra.mxu3 %v229_v20  ;;  %v226_v31 = vld [vmem:[#allocation2 + $0x1b8] sm:$0xff]  ;;  %v223_v33 = vld [vmem:[#allocation2 + $0x1a0] sm:$0xff]  ;;  %v192_v34 = vld [vmem:[#allocation2 + $0xa8] sm:$0xff] }
  0x11   :  { %301 = vmatpush.msra.mxu1 %v234_v14  ;;  %244 = vmatpush.msra.mxu2 %v195_v24  ;;  %v224_v35 = vld [vmem:[#allocation2 + $0x1a8] sm:$0xff]  ;;  %v189_v36 = vld [vmem:[#allocation2 + $0x90] sm:$0xff]  ;;  %v190_v38 = vld [vmem:[#allocation2 + $0x98] sm:$0xff] }
  0x12   :  { %282 = vmatpush.msra.mxu0 %v200_v17  ;;  %264 = vmatpush.msra.mxu3 %v227_v25  ;;  %v221_v37 = vld [vmem:[#allocation2 + $0x190] sm:$0xff]  ;;  %v222_v39 = vld [vmem:[#allocation2 + $0x198] sm:$0xff]  ;;  %v187_v40 = vld [vmem:[#allocation2 + $0x80] sm:$0xff] }
  0x13   :  { %302 = vmatpush.msra.mxu1 %v232_v18  ;;  %412 = vmatmul.msk.f32.vlgmr.msrb.gmra.mxu0 %vm111_vm2, %v48_v21  ;;  %v219_v41 = vld [vmem:[#allocation2 + $0x180] sm:$0xff]  ;;  %v188_v42 = vld [vmem:[#allocation2 + $0x88] sm:$0xff]  ;;  %v185_v44 = vld [vmem:[#allocation2 + $0x70] sm:$0xff] }
  0x14   :  { %414 = vmatmul.msk.f32.vlgmr.msrb.gmra.mxu1 %vm111_vm2, %v48_v21  ;;  %283 = vmatpush.msra.mxu0 %v198_v22  ;;  %v220_v43 = vld [vmem:[#allocation2 + $0x188] sm:$0xff]  ;;  %v217_v45 = vld [vmem:[#allocation2 + $0x170] sm:$0xff]  ;;  %v186_v46 = vld [vmem:[#allocation2 + $0x78] sm:$0xff] }
  0x15   :  { %303 = vmatpush.msra.mxu1 %v230_v23  ;;  %245 = vmatpush.msra.mxu2 %v193_v28  ;;  %v218_v47 = vld [vmem:[#allocation2 + $0x178] sm:$0xff]  ;;  %v183_v48 = vld [vmem:[#allocation2 + $0x60] sm:$0xff]  ;;  %v184_v50 = vld [vmem:[#allocation2 + $0x68] sm:$0xff] }
  0x16   :  { %284 = vmatpush.msra.mxu0 %v196_v26  ;;  %265 = vmatpush.msra.mxu3 %v225_v29  ;;  %v215_v49 = vld [vmem:[#allocation2 + $0x160] sm:$0xff]  ;;  %v216_v51 = vld [vmem:[#allocation2 + $0x168] sm:$0xff]  ;;  %v181_v52 = vld [vmem:[#allocation2 + $0x50] sm:$0xff] }
  0x17   :  { %304 = vmatpush.msra.mxu1 %v228_v27  ;;  %246 = vmatpush.msra.mxu2 %v191_v32  ;;  %v213_v53 = vld [vmem:[#allocation2 + $0x150] sm:$0xff]  ;;  %v182_v54 = vld [vmem:[#allocation2 + $0x58] sm:$0xff]  ;;  %v179_v56 = vld [vmem:[#allocation2 + $0x40] sm:$0xff] }
  0x18   :  { %285 = vmatpush.msra.mxu0 %v194_v30  ;;  %266 = vmatpush.msra.mxu3 %v223_v33  ;;  %v214_v55 = vld [vmem:[#allocation2 + $0x158] sm:$0xff]  ;;  %v211_v57 = vld [vmem:[#allocation2 + $0x140] sm:$0xff]  ;;  %v180_v58 = vld [vmem:[#allocation2 + $0x48] sm:$0xff] }
  0x19   :  { %305 = vmatpush.msra.mxu1 %v226_v31  ;;  %247 = vmatpush.msra.mxu2 %v189_v36  ;;  %v212_v59 = vld [vmem:[#allocation2 + $0x148] sm:$0xff]  ;;  %v177_v60 = vld [vmem:[#allocation2 + $0x30] sm:$0xff]  ;;  %v178_v62 = vld [vmem:[#allocation2 + $0x38] sm:$0xff] }
  0x1a   :  { %286 = vmatpush.msra.mxu0 %v192_v34  ;;  %267 = vmatpush.msra.mxu3 %v221_v37  ;;  %v209_v61 = vld [vmem:[#allocation2 + $0x130] sm:$0xff]  ;;  %v210_v63 = vld [vmem:[#allocation2 + $0x138] sm:$0xff]  ;;  %v175_v0 = vld [vmem:[#allocation2 + $0x20] sm:$0xff] }
  0x1b   :  { %306 = vmatpush.msra.mxu1 %v224_v35  ;;  %248 = vmatpush.msra.mxu2 %v187_v40  ;;  %v207_v1 = vld [vmem:[#allocation2 + $0x120] sm:$0xff]  ;;  %v176_v2 = vld [vmem:[#allocation2 + $0x28] sm:$0xff]  ;;  %v173_v4 = vld [vmem:[#allocation2 + $0x10] sm:$0xff] }
  0x1c   :  { %287 = vmatpush.msra.mxu0 %v190_v38  ;;  %268 = vmatpush.msra.mxu3 %v219_v41  ;;  %v208_v3 = vld [vmem:[#allocation2 + $0x128] sm:$0xff]  ;;  %v205_v5 = vld [vmem:[#allocation2 + $0x110] sm:$0xff]  ;;  %v174_v6 = vld [vmem:[#allocation2 + $0x18] sm:$0xff] }
  0x1d   :  { %307 = vmatpush.msra.mxu1 %v222_v39  ;;  %249 = vmatpush.msra.mxu2 %v185_v44  ;;  %v206_v7 = vld [vmem:[#allocation2 + $0x118] sm:$0xff]  ;;  %v171_v8 = vld [vmem:[#allocation2] sm:$0xff]  ;;  %v172_v10 = vld [vmem:[#allocation2 + $0x8] sm:$0xff] }
  0x1e   :  { %288 = vmatpush.msra.mxu0 %v188_v42  ;;  %269 = vmatpush.msra.mxu3 %v217_v45  ;;  %v203_v9 = vld [vmem:[#allocation2 + $0x100] sm:$0xff]  ;;  %v204_v11 = vld [vmem:[#allocation2 + $0x108] sm:$0xff]  ;;  %v354_v12 = vld [vmem:[%s658_s7 + $0xf8] sm:$0xff] }
  0x1f   :  { %308 = vmatpush.msra.mxu1 %v220_v43  ;;  %250 = vmatpush.msra.mxu2 %v183_v48  ;;  %v353_v13 = vld [vmem:[%s658_s7 + $0xf0] sm:$0xff]  ;;  %v338_v14 = vld [vmem:[%s658_s7 + $0x78] sm:$0xff]  ;;  %v352_v16 = vld [vmem:[%s658_s7 + $0xe8] sm:$0xff] }
  0x20   :  { %289 = vmatpush.msra.mxu0 %v186_v46  ;;  %270 = vmatpush.msra.mxu3 %v215_v49  ;;  %v337_v15 = vld [vmem:[%s658_s7 + $0x70] sm:$0xff]  ;;  %v336_v17 = vld [vmem:[%s658_s7 + $0x68] sm:$0xff]  ;;  %v351_v18 = vld [vmem:[%s658_s7 + $0xe0] sm:$0xff] }
  0x21   :  { %309 = vmatpush.msra.mxu1 %v218_v47  ;;  %251 = vmatpush.msra.mxu2 %v181_v52  ;;  %v335_v19 = vld [vmem:[%s658_s7 + $0x60] sm:$0xff]  ;;  %v350_v20 = vld [vmem:[%s658_s7 + $0xd8] sm:$0xff]  ;;  %v349_v22 = vld [vmem:[%s658_s7 + $0xd0] sm:$0xff] }
  0x22   :  { %290 = vmatpush.msra.mxu0 %v184_v50  ;;  %271 = vmatpush.msra.mxu3 %v213_v53  ;;  %v334_v21 = vld [vmem:[%s658_s7 + $0x58] sm:$0xff]  ;;  %v333_v23 = vld [vmem:[%s658_s7 + $0x50] sm:$0xff]  ;;  %v348_v24 = vld [vmem:[%s658_s7 + $0xc8] sm:$0xff] }
  0x23   :  { %310 = vmatpush.msra.mxu1 %v216_v51  ;;  %252 = vmatpush.msra.mxu2 %v179_v56  ;;  %v332_v25 = vld [vmem:[%s658_s7 + $0x48] sm:$0xff]  ;;  %v347_v26 = vld [vmem:[%s658_s7 + $0xc0] sm:$0xff]  ;;  %v346_v28 = vld [vmem:[%s658_s7 + $0xb8] sm:$0xff] }
  0x24   :  { %291 = vmatpush.msra.mxu0 %v182_v54  ;;  %272 = vmatpush.msra.mxu3 %v211_v57  ;;  %v331_v27 = vld [vmem:[%s658_s7 + $0x40] sm:$0xff]  ;;  %v330_v29 = vld [vmem:[%s658_s7 + $0x38] sm:$0xff]  ;;  %v345_v32 = vld [vmem:[%s658_s7 + $0xb0] sm:$0xff] }
  0x25   :  { %311 = vmatpush.msra.mxu1 %v214_v55  ;;  %253 = vmatpush.msra.mxu2 %v177_v60  ;;  %v344_v33 = vld [vmem:[%s658_s7 + $0xa8] sm:$0xff]  ;;  %v161_v34 = vld [vmem:[%s655_s4] sm:$0x3]  ;;  %v329_v46 = vld [vmem:[%s658_s7 + $0x30] sm:$0xff] }
  0x26   :  { %292 = vmatpush.msra.mxu0 %v180_v58  ;;  %273 = vmatpush.msra.mxu3 %v209_v61  ;;  %v343_v35 = vld [vmem:[%s658_s7 + $0xa0] sm:$0xff]  ;;  %v163_v36 = vperm.slane %v161_v34, 0  ;;  %v164_v37 = vperm.slane %v161_v34, 1  ;;  %v342_v47 = vld [vmem:[%s658_s7 + $0x98] sm:$0xff]  ;;  %v328_v48 = vld [vmem:[%s658_s7 + $0x28] sm:$0xff] }
  0x27   :  { %312 = vmatpush.msra.mxu1 %v212_v59  ;;  %254 = vmatpush.msra.mxu2 %v175_v0  ;;  %v341_v49 = vld [vmem:[%s658_s7 + $0x90] sm:$0xff]  ;;  %v327_v50 = vld [vmem:[%s658_s7 + $0x20] sm:$0xff]  ;;  %v340_v51 = vld [vmem:[%s658_s7 + $0x88] sm:$0xff] }
  0x28   :  { %293 = vmatpush.msra.mxu0 %v178_v62  ;;  %274 = vmatpush.msra.mxu3 %v207_v1  ;;  %v326_v52 = vld [vmem:[%s658_s7 + $0x18] sm:$0xff]  ;;  %v339_v53 = vld [vmem:[%s658_s7 + $0x80] sm:$0xff]  ;;  %v325_v54 = vld [vmem:[%s658_s7 + $0x10] sm:$0xff] }
  0x29   :  { %313 = vmatpush.msra.mxu1 %v210_v63  ;;  %255 = vmatpush.msra.mxu2 %v173_v4  ;;  %v324_v55 = vld [vmem:[%s658_s7 + $0x8] sm:$0xff]  ;;  %v323_v56 = vld [vmem:[%s658_s7] sm:$0xff] }
  0x2a   :  { %294 = vmatpush.msra.mxu0 %v176_v2  ;;  %275 = vmatpush.msra.mxu3 %v205_v5  ;;  %v235_v57 = vld [vmem:[%s657_s6] sm:$0x3] }
  0x2b   :  { %314 = vmatpush.msra.mxu1 %v208_v3  ;;  %256 = vmatpush.msra.mxu2 %v171_v8  ;;  %v238_v58 = vperm.slane %v235_v57, 1  ;;  %v237_v62 = vperm.slane %v235_v57, 0 }
  0x2c   :  { %295 = vmatpush.msra.mxu0 %v174_v6  ;;  %276 = vmatpush.msra.mxu3 %v203_v9  ;;  %v418_v6 = vld [vmem:[%s659_s8] ss:$0 sm:$0xff] }
  0x2d   :  { %315 = vmatpush.msra.mxu1 %v206_v7  ;;  %359 = vmatpush.msrb.mxu2 %v338_v14 }
  0x2e   :  { %296 = vmatpush.msra.mxu0 %v172_v10  ;;  %379 = vmatpush.msrb.mxu3 %v354_v12 }
  0x2f   :  { %316 = vmatpush.msra.mxu1 %v204_v11  ;;  %360 = vmatpush.msrb.mxu2 %v337_v15 }
  0x30   :  { %380 = vmatpush.msrb.mxu3 %v353_v13 }
  0x31   :  { %361 = vmatpush.msrb.mxu2 %v336_v17 }
  0x32   :  { %381 = vmatpush.msrb.mxu3 %v352_v16 }
  0x33   :  { %362 = vmatpush.msrb.mxu2 %v335_v19 }
  0x34   :  { %382 = vmatpush.msrb.mxu3 %v351_v18 }
  0x35   :  { %363 = vmatpush.msrb.mxu2 %v334_v21 }
  0x36   :  { %383 = vmatpush.msrb.mxu3 %v350_v20 }
  0x37   :  { %364 = vmatpush.msrb.mxu2 %v333_v23 }
  0x38   :  { %384 = vmatpush.msrb.mxu3 %v349_v22 }
  0x39   :  { %365 = vmatpush.msrb.mxu2 %v332_v25 }
  0x3a   :  { %385 = vmatpush.msrb.mxu3 %v348_v24 }
  0x3b   :  { %366 = vmatpush.msrb.mxu2 %v331_v27 }
  0x3c   :  { %386 = vmatpush.msrb.mxu3 %v347_v26 }
  0x3d   :  { %367 = vmatpush.msrb.mxu2 %v330_v29 }
  0x3e   :  { %387 = vmatpush.msrb.mxu3 %v346_v28 }
  0x3f   :  { %368 = vmatpush.msrb.mxu2 %v329_v46 }
  0x40   :  { %388 = vmatpush.msrb.mxu3 %v345_v32 }
  0x41   :  { %369 = vmatpush.msrb.mxu2 %v328_v48 }
  0x42   :  { %389 = vmatpush.msrb.mxu3 %v344_v33 }
  0x43   :  { %370 = vmatpush.msrb.mxu2 %v327_v50 }
  0x44   :  { %390 = vmatpush.msrb.mxu3 %v343_v35 }
  0x45   :  { %371 = vmatpush.msrb.mxu2 %v326_v52 }
  0x46   :  { %391 = vmatpush.msrb.mxu3 %v342_v47 }
  0x47   :  { %372 = vmatpush.msrb.mxu2 %v325_v54 }
  0x48   :  { %392 = vmatpush.msrb.mxu3 %v341_v49 }
  0x49   :  { %373 = vmatpush.msrb.mxu2 %v324_v55 }
  0x4a   :  { %393 = vmatpush.msrb.mxu3 %v340_v51 }
  0x4b   :  { %374 = vmatpush.msrb.mxu2 %v323_v56 }
  0x4c   :  { %394 = vmatpush.msrb.mxu3 %v339_v53 }
  0x88   :  { %v88_v30 = vpop.f32.mrf.mxu0 }
  0x89   :  { %v108_v31 = vpop.f32.mrf.mxu1 }
  0x90   :  { %v138_v38 = vpop.f32.mrf.mxu0 }
  0x91   :  { %v158_v39 = vpop.f32.mrf.mxu1  ;;  %v139_v40 = vadd.f32 %v138_v38, %v88_v30 }
  0x92   :  { %v159_v41 = vadd.f32 %v158_v39, %v108_v31 }
  0x93   :  { %v167_v42 = vadd.f32 %v163_v36, %v139_v40 }
  0x94   :  { %v168_v43 = vadd.f32 %v164_v37, %v159_v41 }
  0x95   :  { %v169_v44 = vmax.f32 %v167_v42, 0.0 }
  0x96   :  { %v170_v45 = vmax.f32 %v168_v43, 0.0 }
  0x97   :  { %257 = vmatmul.f32.vlgmr.msra.gmra.mxu2 %v169_v44  ;;  %297 = vmatmul.f32.vlgmr.msra.gmra.mxu0 %v169_v44 }
  0x98   :  { %277 = vmatmul.f32.vlgmr.msra.gmra.mxu3 %v170_v45  ;;  %317 = vmatmul.f32.vlgmr.msra.gmra.mxu1 %v170_v45 }
 0x114   :  { %v298_v59 = vpop.f32.mrf.mxu0 }
 0x115   :  { %v299_v60 = vadd.f32 %v298_v59, %v238_v58  ;;  %v318_v61 = vpop.f32.mrf.mxu1 }
 0x117   :  { %v319_v63 = vadd.f32 %v318_v61, %v299_v60 }
 0x119   :  { %v322_v0 = vmax.f32 %v319_v63, 0.0 }
 0x11a   :  { %v258_v1 = vpop.f32.mrf.mxu2 }
 0x11b   :  { %v259_v2 = vadd.f32 %v258_v1, %v237_v62  ;;  %v278_v3 = vpop.f32.mrf.mxu3  ;;  %395 = vmatmul.f32.vlgmr.msrb.gmra.mxu3 %v322_v0 }
 0x11d   :  { %v279_v4 = vadd.f32 %v278_v3, %v259_v2 }
 0x11f   :  { %v321_v5 = vmax.f32 %v279_v4, 0.0 }
 0x121   :  { %375 = vmatmul.f32.vlgmr.msrb.gmra.mxu2 %v321_v5 }
 0x19e   :  { %v396_v9 = vpop.f32.mrf.mxu3 }
 0x1a4   :  { %v376_v7 = vpop.f32.mrf.mxu2 }
 0x1a5   :  { %v377_v8 = vadd.f32 %v418_v6, %v376_v7 }
 0x1a7   :  { %v397_v10 = vadd.f32 %v396_v9, %v377_v8 }
 0x1a9   :  { %419 = vtanh.f32 %v397_v10 }
 0x1af   :  { %v420_v11 = vpop.eup %419 }
 0x1b0   :  { %401 = vst.msk [vmem:[%s660_s9] sm:$0xff] %vm400_vm3, %v420_v11 }
 0x1b1   :  { %406 = vsyncpa [#allocation3], 1 }

</bundles_post_ra>
